<compile_context>
chip_gen: v7x
topology: tpu7x:2x2x1
jax: 0.10.0
libtpu: 0.0.40
codegen_flags: <defaults>
</compile_context>

<pallas_src>
import jax
import jax.numpy as jnp
from jax import lax
from jax.experimental import pallas as pl
from jax.experimental.pallas import tpu as pltpu


def _make_kernel(bt, HW, A, A4, mm_dtype):
    """bt images per grid step, HW spatial positions per image."""

    def kernel(xp_ref, w1_ref, b1_ref, wh_ref, bh_ref, conf_ref, reg_ref):
        # xp_ref : (9*Cin, bt*HW)   im2col patches (mm_dtype)
        # w1_ref : (Chid, 9*Cin)    conv1 weight  (mm_dtype)
        # b1_ref : (Chid, 1)        conv1 bias    (f32)
        # wh_ref : (4A+A, Chid)     fused reg|conf head weight (mm_dtype)
        # bh_ref : (4A+A, 1)        fused head bias (f32)
        x = xp_ref[...]

        # conv1 (3x3, pad=1) == single im2col matmul on the MXU, f32 acc.
        hid = jnp.dot(w1_ref[...], x, preferred_element_type=jnp.float32)
        # bias + dropout(identity in eval) + ReLU — f32 epilogue.
        hid = jnp.maximum(hid + b1_ref[...], 0.0)          # [Chid, bt*HW]

        # fused 1x1 heads: one matmul, reg rows then conf rows.
        heads = jnp.dot(wh_ref[...], hid.astype(mm_dtype),
                        preferred_element_type=jnp.float32) + bh_ref[...]

        # static unroll over the bt images; lane slices are 128-aligned
        # (HW is a multiple of 128 unless bt spans the full lane axis).
        for b in range(bt):
            sl = slice(b * HW, (b + 1) * HW)
            reg_ref[b] = heads[:A4, sl].astype(reg_ref.dtype)    # [4A, HW]
            conf_ref[b] = heads[A4:, sl].astype(conf_ref.dtype)  # [A,  HW]

    return kernel


def _pick_batch_tile(N, HW):
    """Images per grid step: fatter steps, but keep >=2 slices for v7x's 2 TCs."""
    if HW % 128 != 0:
        return N          # block must then span the full lane axis
    target = max(1, N // 2)
    for bt in range(target, 0, -1):
        if N % bt == 0:
            return bt
    return 1


def proposal_module_forward(x_nchw, params, *, matmul_dtype=jnp.bfloat16,
                            batch_tile=None):
    """Eval-mode forward. x_nchw: [N, Cin, H, W] float32.

    Returns (conf_scores_pred [N, A, H, W], offsets_pos [(N*4A*H*W)//4, 4]),
    matching the PyTorch module's eval branch.
    """
    w1, b1, wc, bc, wr, br = (params[k] for k in
                              ("w1", "b1", "wc", "bc", "wr", "br"))
    N, Cin, H, W = x_nchw.shape
    Chid = w1.shape[3]
    A = wc.shape[1]
    A4 = wr.shape[1]
    HW = H * W
    nine_cin = 9 * Cin

    bt = _pick_batch_tile(N, HW) if batch_tile is None else batch_tile
    assert N % bt == 0, "batch_tile must divide N"

    # ---------------- wrapper-side im2col (layout plumbing) -----------------
    x_nhwc = jnp.transpose(x_nchw, (0, 2, 3, 1))
    x_pad = jnp.pad(x_nhwc, ((0, 0), (1, 1), (1, 1), (0, 0)))
    taps = [x_pad[:, kh:kh + H, kw:kw + W, :]
            for kh in range(3) for kw in range(3)]          # 9 x [N,H,W,Cin]
    patches = jnp.stack(taps, axis=3)                       # [N,H,W,9,Cin]
    patches = patches.reshape(N, HW, nine_cin)              # tap-major, cin-minor
    patches = jnp.transpose(patches, (2, 0, 1)).reshape(nine_cin, N * HW)
    patches = patches.astype(matmul_dtype)

    # weights in channels-as-rows layout; heads fused (reg rows, then conf).
    w1_mat = jnp.transpose(w1.reshape(nine_cin, Chid)).astype(matmul_dtype)
    b1_col = b1.reshape(Chid, 1).astype(jnp.float32)
    wh = jnp.concatenate([wr.T, wc.T], axis=0).astype(matmul_dtype)   # [4A+A, Chid]
    bh = jnp.concatenate([br, bc], axis=1).reshape(A4 + A, 1).astype(jnp.float32)

    kernel = _make_kernel(bt, HW, A, A4, matmul_dtype)

    # ------------------------- explicit VMEM budget -------------------------
    mm_bytes = jnp.dtype(matmul_dtype).itemsize
    tile_in = nine_cin * bt * HW * mm_bytes
    tile_w = (Chid * nine_cin + (A4 + A) * Chid) * mm_bytes + (Chid + A4 + A) * 4
    tile_out = bt * (A4 + A) * HW * 4
    interm = (Chid + A4 + A) * bt * HW * 4 * 2               # hid + heads live
    vmem_needed = 2 * (tile_in + tile_w + tile_out) + interm  # double-buffered
    vmem_limit = int(min(64 << 20, max(4 * vmem_needed, 16 << 20)))

    conf_out, reg_out = pl.pallas_call(
        kernel,
        out_shape=(
            jax.ShapeDtypeStruct((N, A, HW), jnp.float32),
            jax.ShapeDtypeStruct((N, A4, HW), jnp.float32),
        ),
        grid_spec=pltpu.PrefetchScalarGridSpec(
            num_scalar_prefetch=0,
            grid=(N // bt,),
            in_specs=[
                pl.BlockSpec((nine_cin, bt * HW), lambda nb: (0, nb)),
                pl.BlockSpec((Chid, nine_cin), lambda nb: (0, 0)),
                pl.BlockSpec((Chid, 1), lambda nb: (0, 0)),
                pl.BlockSpec((A4 + A, Chid), lambda nb: (0, 0)),
                pl.BlockSpec((A4 + A, 1), lambda nb: (0, 0)),
            ],
            out_specs=[
                pl.BlockSpec((bt, A, HW), lambda nb: (nb, 0, 0)),
                pl.BlockSpec((bt, A4, HW), lambda nb: (nb, 0, 0)),
            ],
        ),
        compiler_params=pltpu.CompilerParams(
            dimension_semantics=("parallel",),
            vmem_limit_bytes=vmem_limit),
    )(patches, w1_mat, b1_col, wh, bh)

    # outputs are already NCHW-flattened: pure reshapes, no transposes.
    conf_scores_pred = conf_out.reshape(N, A, H, W)
    offsets_pos = reg_out.reshape(-1, 4)     # == reg_offsets_pred.view(-1, 4)
    return conf_scores_pred, offsets_pos


def _reference_forward(x_nchw, params):
    """Pure-JAX f32 reference of the eval branch (for a sanity check)."""
    w1, b1, wc, bc, wr, br = (params[k] for k in
                              ("w1", "b1", "wc", "bc", "wr", "br"))
    x_nhwc = jnp.transpose(x_nchw, (0, 2, 3, 1))
    out = lax.conv_general_dilated(
        x_nhwc, w1, window_strides=(1, 1), padding="SAME",
        dimension_numbers=("NHWC", "HWIO", "NHWC")) + b1.reshape(1, 1, 1, -1)
    out = jnp.maximum(out, 0.0)
    conf = jnp.einsum("nhwc,ca->nhwa", out, wc) + bc.reshape(1, 1, 1, -1)
    reg = jnp.einsum("nhwc,ca->nhwa", out, wr) + br.reshape(1, 1, 1, -1)
    conf_nchw = jnp.transpose(conf, (0, 3, 1, 2))
    reg_nchw = jnp.transpose(reg, (0, 3, 1, 2))
    return conf_nchw, reg_nchw.reshape(-1, 4)


def init_params(key, in_features, hidden_dim, n_anchors):
    """Deterministic synthetic weights (shapes match the nn.Module).

    conv1: torch weight [Chid, Cin, 3, 3] must be converted via
    transpose(2, 3, 1, 0) to the [3, 3, Cin, Chid] layout used here.
    """
    ks = jax.random.split(key, 6)
    w1 = 0.1 * jax.random.normal(ks[0], (3, 3, in_features, hidden_dim),
                                 jnp.float32)
    b1 = 0.1 * jax.random.normal(ks[1], (1, hidden_dim), jnp.float32)
    wc = 0.1 * jax.random.normal(ks[2], (hidden_dim, n_anchors), jnp.float32)
    bc = 0.1 * jax.random.normal(ks[3], (1, n_anchors), jnp.float32)
    wr = 0.1 * jax.random.normal(ks[4], (hidden_dim, 4 * n_anchors),
                                 jnp.float32)
    br = 0.1 * jax.random.normal(ks[5], (1, 4 * n_anchors), jnp.float32)
    return dict(w1=w1, b1=b1, wc=wc, bc=bc, wr=wr, br=br)


if __name__ == "__main__":
    # small shapes consistent with the module's forward
    N, Cin, H, W = 2, 4, 16, 16
    hidden_dim, n_anchors = 32, 8

    key = jax.random.PRNGKey(0)
    k_x, k_p = jax.random.split(key)
    x = jax.random.normal(k_x, (N, Cin, H, W), jnp.float32)
    params = init_params(k_p, Cin, hidden_dim, n_anchors)

    conf_scores_pred, offsets_pos = jax.block_until_ready(
        proposal_module_forward(x, params))

    assert conf_scores_pred.shape == (N, n_anchors, H, W)
    assert offsets_pos.shape == (N * 4 * n_anchors * H * W // 4, 4)

    # sanity check against a pure-JAX f32 reference (bf16 MXU operands ->
    # generous tolerance).
    conf_ref, off_ref = _reference_forward(x, params)
    assert bool(jnp.allclose(conf_scores_pred, conf_ref, atol=3e-2, rtol=3e-2))
    assert bool(jnp.allclose(offsets_pos, off_ref, atol=3e-2, rtol=3e-2))

    print("KERNEL_OK")
</pallas_src>

<mosaic_0001>
module attributes {stable_mosaic.version = 11 : i64} {
  func.func @kernel(%arg0: i32, %arg1: memref<36x256xbf16, #tpu.memory_space<vmem>>, %arg2: memref<32x36xbf16, #tpu.memory_space<vmem>>, %arg3: memref<32x1xf32, #tpu.memory_space<vmem>>, %arg4: memref<40x32xbf16, #tpu.memory_space<vmem>>, %arg5: memref<40x1xf32, #tpu.memory_space<vmem>>, %arg6: memref<1x8x256xf32, #tpu.memory_space<vmem>>, %arg7: memref<1x32x256xf32, #tpu.memory_space<vmem>>) attributes {dimension_semantics = [#tpu.dimension_semantics<parallel>], iteration_bounds = array<i64: 2>, scalar_prefetch = 0 : i64, scratch_operands = 0 : i64, tpu.core_type = #tpu.core_type<tc>, window_params = [{transform_indices = @transform_0, window_bounds = array<i64: 36, 256>}, {pipeline_mode = #tpu.pipeline_mode<synchronous>, transform_indices = @transform_1, window_bounds = array<i64: 32, 36>}, {pipeline_mode = #tpu.pipeline_mode<synchronous>, transform_indices = @transform_2, window_bounds = array<i64: 32, 1>}, {pipeline_mode = #tpu.pipeline_mode<synchronous>, transform_indices = @transform_3, window_bounds = array<i64: 40, 32>}, {pipeline_mode = #tpu.pipeline_mode<synchronous>, transform_indices = @transform_4, window_bounds = array<i64: 40, 1>}, {transform_indices = @transform_5, window_bounds = array<i64: 1, 8, 256>}, {transform_indices = @transform_6, window_bounds = array<i64: 1, 32, 256>}]} {
    %c0 = arith.constant 0 : index
    %c0_0 = arith.constant 0 : index
    %0 = vector.load %arg1[%c0, %c0_0] : memref<36x256xbf16, #tpu.memory_space<vmem>>, vector<36x256xbf16>
    %c0_1 = arith.constant 0 : index
    %c0_2 = arith.constant 0 : index
    %1 = vector.load %arg2[%c0_1, %c0_2] : memref<32x36xbf16, #tpu.memory_space<vmem>>, vector<32x36xbf16>
    %cst = arith.constant dense<0.000000e+00> : vector<32x256xf32>
    %2 = tpu.matmul %1, %0, %cst {dimension_numbers = #tpu.dot_dimension_numbers<[1], [0], [0], [1], [0, 0, 1, 1], [], []>} : vector<32x36xbf16>, vector<36x256xbf16>, vector<32x256xf32> -> vector<32x256xf32>
    %c0_3 = arith.constant 0 : index
    %c0_4 = arith.constant 0 : index
    %3 = vector.load %arg3[%c0_3, %c0_4] : memref<32x1xf32, #tpu.memory_space<vmem>>, vector<32x1xf32>
    %4 = vector.broadcast %3 : vector<32x1xf32> to vector<32x256xf32>
    %5 = arith.addf %2, %4 : vector<32x256xf32>
    %cst_5 = arith.constant 0.000000e+00 : f32
    %6 = vector.broadcast %cst_5 : f32 to vector<32x256xf32>
    %7 = arith.maximumf %5, %6 : vector<32x256xf32>
    %c0_6 = arith.constant 0 : index
    %c0_7 = arith.constant 0 : index
    %8 = vector.load %arg4[%c0_6, %c0_7] : memref<40x32xbf16, #tpu.memory_space<vmem>>, vector<40x32xbf16>
    %9 = arith.truncf %7 : vector<32x256xf32> to vector<32x256xbf16>
    %cst_8 = arith.constant dense<0.000000e+00> : vector<40x256xf32>
    %10 = tpu.matmul %8, %9, %cst_8 {dimension_numbers = #tpu.dot_dimension_numbers<[1], [0], [0], [1], [0, 0, 1, 1], [], []>} : vector<40x32xbf16>, vector<32x256xbf16>, vector<40x256xf32> -> vector<40x256xf32>
    %c0_9 = arith.constant 0 : index
    %c0_10 = arith.constant 0 : index
    %11 = vector.load %arg5[%c0_9, %c0_10] : memref<40x1xf32, #tpu.memory_space<vmem>>, vector<40x1xf32>
    %12 = vector.broadcast %11 : vector<40x1xf32> to vector<40x256xf32>
    %13 = arith.addf %10, %12 : vector<40x256xf32>
    %14 = vector.extract_strided_slice %13 {offsets = [0, 0], sizes = [32, 256], strides = [1, 1]} : vector<40x256xf32> to vector<32x256xf32>
    %c0_11 = arith.constant 0 : index
    %c0_12 = arith.constant 0 : index
    %c0_13 = arith.constant 0 : index
    %15 = vector.load %arg7[%c0_11, %c0_12, %c0_13] : memref<1x32x256xf32, #tpu.memory_space<vmem>>, vector<1x32x256xf32>
    %16 = vector.shape_cast %15 : vector<1x32x256xf32> to vector<32x256xf32>
    %17 = vector.shape_cast %14 : vector<32x256xf32> to vector<1x32x256xf32>
    tpu.vector_store %arg7[%c0_11, %c0_12, %c0_13], %17 {strides = array<i32>} : memref<1x32x256xf32, #tpu.memory_space<vmem>>, vector<1x32x256xf32>,
    %18 = vector.extract_strided_slice %13 {offsets = [32, 0], sizes = [8, 256], strides = [1, 1]} : vector<40x256xf32> to vector<8x256xf32>
    %c0_14 = arith.constant 0 : index
    %c0_15 = arith.constant 0 : index
    %c0_16 = arith.constant 0 : index
    %19 = vector.load %arg6[%c0_14, %c0_15, %c0_16] : memref<1x8x256xf32, #tpu.memory_space<vmem>>, vector<1x8x256xf32>
    %20 = vector.shape_cast %19 : vector<1x8x256xf32> to vector<8x256xf32>
    %21 = vector.shape_cast %18 : vector<8x256xf32> to vector<1x8x256xf32>
    tpu.vector_store %arg6[%c0_14, %c0_15, %c0_16], %21 {strides = array<i32>} : memref<1x8x256xf32, #tpu.memory_space<vmem>>, vector<1x8x256xf32>,
    return
  }
  func.func @transform_0(%arg0: i32) -> (i32, i32) {
    %c0_i32 = arith.constant 0 : i32
    %c0_i32_0 = arith.constant 0 : i32
    return %c0_i32, %arg0 : i32, i32
  }
  func.func @transform_1(%arg0: i32) -> (i32, i32) {
    %c0_i32 = arith.constant 0 : i32
    %c0_i32_0 = arith.constant 0 : i32
    %c0_i32_1 = arith.constant 0 : i32
    return %c0_i32, %c0_i32_0 : i32, i32
  }
  func.func @transform_2(%arg0: i32) -> (i32, i32) {
    %c0_i32 = arith.constant 0 : i32
    %c0_i32_0 = arith.constant 0 : i32
    %c0_i32_1 = arith.constant 0 : i32
    return %c0_i32, %c0_i32_0 : i32, i32
  }
  func.func @transform_3(%arg0: i32) -> (i32, i32) {
    %c0_i32 = arith.constant 0 : i32
    %c0_i32_0 = arith.constant 0 : i32
    %c0_i32_1 = arith.constant 0 : i32
    return %c0_i32, %c0_i32_0 : i32, i32
  }
  func.func @transform_4(%arg0: i32) -> (i32, i32) {
    %c0_i32 = arith.constant 0 : i32
    %c0_i32_0 = arith.constant 0 : i32
    %c0_i32_1 = arith.constant 0 : i32
    return %c0_i32, %c0_i32_0 : i32, i32
  }
  func.func @transform_5(%arg0: i32) -> (i32, i32, i32) {
    %c0_i32 = arith.constant 0 : i32
    %c0_i32_0 = arith.constant 0 : i32
    %c0_i32_1 = arith.constant 0 : i32
    return %arg0, %c0_i32, %c0_i32_0 : i32, i32, i32
  }
  func.func @transform_6(%arg0: i32) -> (i32, i32, i32) {
    %c0_i32 = arith.constant 0 : i32
    %c0_i32_0 = arith.constant 0 : i32
    %c0_i32_1 = arith.constant 0 : i32
    return %arg0, %c0_i32, %c0_i32_0 : i32, i32, i32
  }
}

</mosaic_0001>

<bundles_post_ra>
// kernel: tpu_custom_call.1
= control target key start
LH: loop header
LB: loop body
LE: loop exit
PB: predicated region body
PF: predicated region fallthrough
CT: control target
= control target key end

     0   :  { %12 = vsyncpa [#allocation4], 0  ;;  %s1160_s0 = inlined_call_operand.vmem [shape: bf16[36,512], index: 0, kind: input, shape index: {}]   ;;  %s1161_s1 = inlined_call_operand.vmem [shape: bf16[32,36], index: 1, kind: input, shape index: {}]   ;;  %s1162_s2 = inlined_call_operand.vmem [shape: f32[32,1], index: 2, kind: input, shape index: {}]   ;;  %s1163_s3 = inlined_call_operand.vmem [shape: bf16[40,32], index: 3, kind: input, shape index: {}]   ;;  %s1164_s4 = inlined_call_operand.vmem [shape: f32[40,1], index: 4, kind: input, shape index: {}]   ;;  %s1165_s5 = inlined_call_operand.hbm [shape: f32[2,8,256], index: 5, kind: output, shape index: {0}]   ;;  %s1166_s6 = inlined_call_operand.hbm [shape: f32[2,32,256], index: 6, kind: output, shape index: {1}]  }
   0x1   :  { %14 = vsyncpa [#allocation4 + $0x1], 0 }
   0x2   :  { %15 = vsyncpa [#allocation6], 0 }
   0x3   :  { %17 = vsyncpa [#allocation6 + $0x1], 0  ;;  %s959_s21 = smov 0   ;;  %s961_s22 = smov 0  }
   0x4   :  { %s963_s23 = smov 0   ;;  %s965_s24 = smov 0  }
   0x5 LB: > { %s980_s25 = sadd.s32 4294967295, %s917_s24   ;;  %s723_s26 = sadd.s32 4294967294, %s917_s24   ;;  %s917_s24 = sphi %s965_s24, %s1172_s24   ;;  %s913_s23 = sphi %s963_s23, %s1171_s23   ;;  %s909_s22 = sphi %s961_s22, %s1170_s22   ;;  %s905_s21 = sphi %s959_s21, %s1169_s21  }
   0x6   : > { %s984_s27 = sadd.s32 1, %s917_s24   ;;  %s30_s28 = sadd.s32 1, %s913_s23 }
   0x7   : > { %s27_s29 = ssub.s32 %s917_s24, %s984_s27  ;;  %p37_p0 = scmp.ne.s32.totalorder %s913_s23, %s909_s22 }
   0x8   : > { %p28_p1 = scmp.eq.s32.totalorder %s27_s29, 0  ;;  %p38_p2 = scmp.eq.s32.totalorder %s917_s24, 0 }
   0x9   : > { %p151_p3 = scmp.eq.s32.totalorder %s980_s25, 1  ;;  %p156_p4 = scmp.ne.s32.totalorder %s909_s22, %s905_s21 }
   0xa   : > { %s996_s30 = scalar_select %p28_p1, %s913_s23, %s30_s28  }
   0xb   : > { %p39_p5 = por %p38_p2, %p37_p0  ;;  %p998_p6 = por %p151_p3, %p37_p0 }
   0xc   : > { %p157_p7 = scmp.eq.s32.totalorder %s723_s26, 1  ;;  %p725_p9 = scmp.ge.s32.totalorder %s917_s24, 2 }
   0xe   : > { %p1002_p8 = por %p157_p7, %p156_p4  ;;  %211 = sbr.rel (%p725_p9) target bundleno = 28 (0x1c), region = 32 }
  0x15   : > { %214 = sbr.rel (!%p39_p5) target bundleno = 28 (0x1c), region = 36  ;;  %s216_s9 = sand.u32 (%p39_p5), 1, %s913_s23  }
  0x16   : > { %s756_s10 = sshll.u32 (%p39_p5), %s917_s24, 3  ;;  %s759_s11 = smul.u32 (%p39_p5), 40, %s216_s9 }
  0x17   : > { %s221_s14 = scalar_lea.vmem (%p39_p5), %s1160_s0, %s756_s10 }
  0x18   : > { %v257_v0 = vld [vmem:[%s221_s14] sm:$0xff] (%p39_p5)  ;;  %v259_v1 = vld [vmem:[%s221_s14 + $0x10] sm:$0xff] (%p39_p5)  ;;  %s218_s15 = scalar_lea.vmem (%p39_p5), [#allocation2], %s759_s11 }
  0x19   : > { %v261_v2 = vld [vmem:[%s221_s14 + $0x20] sm:$0xff] (%p39_p5)  ;;  %v263_v3 = vld [vmem:[%s221_s14 + $0x30] sm:$0xff] (%p39_p5)  ;;  %258 = vst [vmem:[%s218_s15] sm:$0xff] (%p39_p5), %v257_v0  ;;  %260 = vst [vmem:[%s218_s15 + $0x8] sm:$0xff] (%p39_p5), %v259_v1 }
  0x1a   : > { %v265_v4 = vld [vmem:[%s221_s14 + $0x40] sm:$0xff] (%p39_p5)  ;;  %262 = vst [vmem:[%s218_s15 + $0x10] sm:$0xff] (%p39_p5), %v261_v2  ;;  %264 = vst [vmem:[%s218_s15 + $0x18] sm:$0xff] (%p39_p5), %v263_v3 }
  0x1b   : > { %266 = vst [vmem:[%s218_s15 + $0x20] sm:$0xff] (%p39_p5), %v265_v4 }
  0x1c PF: > { %p728_p10 = scmp.ge.s32.totalorder %s917_s24, 1  ;;  %p271_p11 = scmp.lt.s32.totalorder %s917_s24, 3 }
  0x1e   : > { %p272_p12 = pnand %p728_p10, %p271_p11 }
  0x1f   : > { %s1017_s16 = sand.u32 (!%p272_p12), 1, %s909_s22   ;;  %v919_v5 = vmov (!%p272_p12), 0   ;;  %v323_v6 = vld [vmem:[%s1162_s2] sm:$0xff] (!%p272_p12)  ;;  %v324_v7 = vld [vmem:[%s1162_s2 + $0x8] sm:$0xff] (!%p272_p12)  ;;  %v325_v8 = vld [vmem:[%s1162_s2 + $0x10] sm:$0xff] (!%p272_p12)  ;;  %vm389_vm0 = vcmask (!%p272_p12), 1041408  }
  0x20   : > { %275 = sbr.rel (%p272_p12) target bundleno = 545 (0x221), region = 74  ;;  %428 = vmatprep.mubr.bf16.mxu0 (!%p272_p12), %v919_v5  ;;  %808 = vset.pattern.permute.xlu0 (!%p272_p12), %v919_v5  ;;  %v326_v14 = vld [vmem:[%s1162_s2 + $0x18] sm:$0xff] (!%p272_p12)  ;;  %v466_v17 = vld [vmem:[%s1164_s4] sm:$0xff] (!%p272_p12)  ;;  %v467_v18 = vld [vmem:[%s1164_s4 + $0x8] sm:$0xff] (!%p272_p12)  ;;  %vm382_vm1 = vcmask (!%p272_p12), 293888   ;;  %vm509_vm2 = vcmask (!%p272_p12), 261120  }
  0x21   : > { %s760_s17 = smul.u32 (!%p272_p12), 40, %s1017_s16  ;;  %809 = vset.pattern.permute.xlu1 (!%p272_p12), %v919_v5  ;;  %551 = vmatprep.mubr.bf16.mxu1 (!%p272_p12), %v919_v5  ;;  %v468_v20 = vld [vmem:[%s1164_s4 + $0x10] sm:$0xff] (!%p272_p12)  ;;  %v818_v21 = vld [vmem:[%s1161_s1] sm:$0xff] (!%p272_p12)   ;;  %v469_v22 = vld [vmem:[%s1164_s4 + $0x18] sm:$0xff] (!%p272_p12)  ;;  %s730_s19 = sshll.u32 (!%p272_p12), %s1017_s16, 6 }
  0x22   : > { %329 = vperm.xlu0 (!%p272_p12), %808, %v323_v6   ;;  %339 = vperm.xlu1 (!%p272_p12), %809, %v325_v8   ;;  %v470_v23 = vld [vmem:[%s1164_s4 + $0x20] sm:$0xff] (!%p272_p12)  ;;  %v819_v24 = vld [vmem:[%s1161_s1 + $0x8] sm:$0xff] (!%p272_p12)   ;;  %v822_v59 = vld [vmem:[%s1163_s3 + $0x10] ss:$0 sps:$4 sm:$0xff] (!%p272_p12)   ;;  %s311_s20 = scalar_lea.vmem (!%p272_p12), [#allocation5], %s730_s19  ;;  %s729_s28 = sshll.u32 (!%p272_p12), %s1017_s16, 4 }
  0x23   : > { %s280_s9 = scalar_lea.vmem (!%p272_p12), [#allocation2], %s760_s17  ;;  %v820_v57 = vld [vmem:[%s1163_s3] sm:$0xff] (!%p272_p12)   ;;  %v821_v58 = vld [vmem:[%s1163_s3 + $0x8] sm:$0xff] (!%p272_p12)   ;;  %s623_s26 = sshll.u32 (!%p272_p12), %s311_s20, 4  ;;  %s1072_s26 = int_to_ptr.vmem [resolvable:$true] %s623_s26 }
  0x24   : > { %v810_v9 = vld [vmem:[%s280_s9 + $0x4] ss:$8 sps:$4 sm:$0xff] (!%p272_p12)   ;;  %v812_v10 = vld [vmem:[%s280_s9] ss:$8 sps:$4 sm:$0xff] (!%p272_p12)   ;;  %v813_v11 = vld [vmem:[%s280_s9 + $0x14] ss:$8 sps:$4 sm:$0xff] (!%p272_p12)  }
  0x25   : > { %396 = vmatprep.subr.bf16.mxu0 (!%p272_p12), %v810_v9  ;;  %v318_v12 = vld [vmem:[%s280_s9 + $0x20] sm:$0x33] (!%p272_p12)  ;;  %v815_v13 = vld [vmem:[%s280_s9 + $0x10] ss:$8 sps:$4 sm:$0xff] (!%p272_p12)   ;;  %s758_s29 = sshll.u32 (!%p272_p12), %s980_s25, 10  ;;  %s757_s12 = sshll.u32 (!%p272_p12), %s980_s25, 8 }
  0x26   : > { %397 = vmatpush1.bf16.msra.mxu0 (!%p272_p12), %v812_v10  ;;  %v738_v15 = vcombine.high (!%p272_p12), %v318_v12, %v318_v12  ;;  %v737_v16 = vcombine.low (!%p272_p12), %v318_v12, %v318_v12  ;;  %334 = vperm.xlu0 (!%p272_p12), %808, %v324_v7   ;;  %s1077_s11 = scalar_lea.hbm (!%p272_p12), %s1166_s6, %s758_s29  ;;  %s1080_s13 = scalar_lea.vmem (!%p272_p12), [#allocation3], %s729_s28 }
  0x27   : > { %398 = vmatprep.subr.bf16.mxu0 %v813_v11  ;;  %344 = vperm.xlu1 %809, %v326_v14   ;;  %s610_s14 = sshll.u32 %s1080_s13, 4  ;;  %s596_s15 = scalar_lea.sflag [#allocation6], %s1017_s16  ;;  %s1116_s14 = int_to_ptr.vmem [resolvable:$true] %s610_s14 }
  0x28   : > { %v391_v19 = vsel %vm389_vm0, %v737_v16, 0  ;;  %s823_s17 = scalar_lea.vmem %s1072_s26, 1024  ;;  %s920_s18 = smov [#allocation5]  }
  0x29   : > { %p824_p13 = scmp.ne.s32.totalorder %s1072_s26, %s823_s17  ;;  %s827_s19 = sshll.u32 %s920_s18, 4  ;;  %s828_s19 = int_to_ptr.vmem [resolvable:$false] %s827_s19 }
  0x2a   : > { %399 = vmatpush1.bf16.msra.mxu0 %v815_v13  ;;  %473 = vperm.xlu0 %808, %v466_v17   ;;  %s829_s29 = scalar_lea.vmem %s828_s19, 2048  ;;  %p830_p2 = scmp.lt.s32.totalorder %s1072_s26, %s828_s19 }
  0x2b   : > { %739 = vmatprep.subr.msk.bf16.mxu0 %vm389_vm0, %v738_v15  ;;  %478 = vperm.xlu1 %809, %v467_v18   ;;  %p825_p0 = pnand %p824_p13, %p998_p6  ;;  %p831_p3 = scmp.lt.s32.totalorder %s829_s29, %s823_s17 }
  0x2d   : > { %p826_p1 = pneg %p825_p0  ;;  %p832_p4 = por %p831_p3, %p830_p2 }
  0x2e   : > { %401 = vmatpush1.bf16.msra.mxu0 %v391_v19  ;;  %483 = vperm.xlu0 %808, %v468_v20  }
  0x2f   : > { %488 = vperm.xlu1 %809, %v469_v22   ;;  %p833_p5 = pnand %p832_p4, %p826_p1 }
  0x31   : > { %740 = vmatmul.mubr.msk.bf16.vlgmr.msra.gmra.mrb[0].mxu0 %vm382_vm1, %v818_v21 }
  0x32   : > { %438 = vmatprep.mubr.bf16.mxu0 %v919_v5  ;;  %493 = vperm.xlu0 %808, %v470_v23  }
  0x39   : > { %741 = vmatmul.mubr.msk.bf16.gmra.mrb[4].mxu0 %vm382_vm1, %v819_v24 }
  0xa1   : > { %v330_v25 = vpop.permute.xlu0 %329  ;;  %v340_v34 = vpop.permute.xlu1 %339 }
  0xa5   : > { %v335_v29 = vpop.permute.xlu0 %334 }
  0xa6   : > { %v345_v45 = vpop.permute.xlu1 %344 }
  0xa9   : > { %v474_v60 = vpop.permute.xlu0 %473 }
  0xaa   : > { %v479_v0 = vpop.permute.xlu1 %478 }
  0xad   : > { %v484_v6 = vpop.permute.xlu0 %483 }
  0xae   : > { %v489_v10 = vpop.permute.xlu1 %488 }
 0x104   : > { %v430_v26 = vpop.f32.mrb[0].mxu0 }
 0x105   : > { %v431_v27 = vadd.f32 %v430_v26, %v330_v25  ;;  %v432_v28 = vpop.f32.mrb[1].mxu0 }
 0x106   : > { %v433_v30 = vadd.f32 %v432_v28, %v330_v25  ;;  %v434_v31 = vpop.f32.mrb[2].mxu0 }
 0x107   : > { %v435_v32 = vadd.f32 %v434_v31, %v335_v29  ;;  %v436_v33 = vpop.f32.mrb[3].mxu0  ;;  %v449_v36 = vmax.f32 %v431_v27, 0.0 }
 0x108   : > { %v437_v35 = vadd.f32 %v436_v33, %v335_v29  ;;  %v450_v38 = vmax.f32 %v433_v30, 0.0 }
 0x109   : > { %v451_v37 = vmax.f32 %v435_v32, 0.0 }
 0x10a   : > { %v452_v39 = vmax.f32 %v437_v35, 0.0 }
 0x10b   : > { %v462_v40 = vpack.c.bf16 %v451_v37, %v449_v36 }
 0x10c   : > { %v440_v41 = vpop.f32.mrb[4].mxu0  ;;  %v463_v42 = vpack.c.bf16 %v452_v39, %v450_v38 }
 0x10d   : > { %v441_v43 = vadd.f32 %v440_v41, %v340_v34  ;;  %v442_v44 = vpop.f32.mrb[5].mxu0 }
 0x10e   : > { %v443_v46 = vadd.f32 %v442_v44, %v340_v34  ;;  %v444_v47 = vpop.f32.mrb[6].mxu0  ;;  %519 = vmatprep.subr.bf16.mxu1 %v463_v42 }
 0x10f   : > { %v445_v48 = vadd.f32 %v444_v47, %v345_v45  ;;  %v446_v49 = vpop.f32.mrb[7].mxu0  ;;  %520 = vmatpush1.bf16.msra.mxu1 %v462_v40  ;;  %v453_v51 = vmax.f32 %v441_v43, 0.0 }
 0x110   : > { %v447_v50 = vadd.f32 %v446_v49, %v345_v45  ;;  %v454_v53 = vmax.f32 %v443_v46, 0.0 }
 0x111   : > { %v455_v52 = vmax.f32 %v445_v48, 0.0 }
 0x112   : > { %v456_v54 = vmax.f32 %v447_v50, 0.0 }
 0x113   : > { %v464_v55 = vpack.c.bf16 %v455_v52, %v453_v51 }
 0x114   : > { %v465_v56 = vpack.c.bf16 %v456_v54, %v454_v53 }
 0x116   : > { %521 = vmatprep.subr.bf16.mxu1 %v465_v56 }
 0x117   : > { %522 = vmatpush1.bf16.msra.mxu1 %v464_v55 }
 0x11a   : > { %745 = vmatmul.mubr.msk.bf16.vlgmr.msra.gmra.mrb[0].mxu1 %vm509_vm2, %v820_v57 }
 0x11b   : > { %561 = vmatprep.mubr.bf16.mxu1 %v919_v5 }
 0x122   : > { %746 = vmatmul.mubr.msk.bf16.gmra.mrb[4].mxu1 %vm509_vm2, %v821_v58 }
 0x123   : > { %571 = vmatprep.mubr.bf16.mxu1 %v919_v5 }
 0x12a   : > { %747 = vmatmul.mubr.msk.bf16.gmra.mrb[8].mxu1 %vm509_vm2, %v822_v59 }
 0x1ed   : > { %v553_v61 = vpop.f32.mrb[0].mxu1 }
 0x1ee   : > { %v554_v62 = vadd.f32 %v553_v61, %v474_v60  ;;  %v555_v63 = vpop.f32.mrb[1].mxu1 }
 0x1ef   : > { %v556_v1 = vadd.f32 %v555_v63, %v474_v60  ;;  %v557_v2 = vpop.f32.mrb[2].mxu1 }
 0x1f0   : > { %580 = vst [vmem:[%s311_s20] sm:$0xff] %v554_v62  ;;  %v558_v3 = vadd.f32 %v557_v2, %v479_v0  ;;  %v559_v4 = vpop.f32.mrb[3].mxu1 }
 0x1f1   : > { %581 = vst [vmem:[%s311_s20 + $0x8] sm:$0xff] %v556_v1  ;;  %v560_v5 = vadd.f32 %v559_v4, %v479_v0 }
 0x1f2   : > { %582 = vst [vmem:[%s311_s20 + $0x10] sm:$0xff] %v558_v3 }
 0x1f3   : > { %583 = vst [vmem:[%s311_s20 + $0x18] sm:$0xff] %v560_v5 }
 0x1f5   : > { %v563_v7 = vpop.f32.mrb[4].mxu1 }
 0x1f6   : > { %v564_v8 = vadd.f32 %v563_v7, %v484_v6  ;;  %v565_v9 = vpop.f32.mrb[5].mxu1 }
 0x1f7   : > { %v566_v11 = vadd.f32 %v565_v9, %v484_v6  ;;  %v567_v12 = vpop.f32.mrb[6].mxu1 }
 0x1f8   : > { %584 = vst [vmem:[%s311_s20 + $0x20] sm:$0xff] %v564_v8  ;;  %v568_v13 = vadd.f32 %v567_v12, %v489_v10  ;;  %v569_v14 = vpop.f32.mrb[7].mxu1 }
 0x1f9   : > { %585 = vst [vmem:[%s311_s20 + $0x28] sm:$0xff] %v566_v11  ;;  %v570_v15 = vadd.f32 %v569_v14, %v489_v10 }
 0x1fa   : > { %586 = vst [vmem:[%s311_s20 + $0x30] sm:$0xff] %v568_v13 }
 0x1fb   : > { %587 = vst [vmem:[%s311_s20 + $0x38] sm:$0xff] %v570_v15 }
 0x1fc   : > { %836 = shalt.err (!%p833_p5)
}
 0x1fd   : > { %s837_s20 = scalar_lea.hbm %s1077_s11, 1024  ;;  %s841_s10 = scalar_lea.hbm %s1166_s6, 2048 }
 0x1fe   : > { %p838_p7 = scmp.ne.s32.totalorder %s1077_s11, %s837_s20  ;;  %p842_p12 = scmp.lt.u32.totalorder %s1077_s11, %s1166_s6 }
 0x1ff   : > { %p843_p13 = scmp.lt.u32.totalorder %s841_s10, %s837_s20  ;;  %p845_p1 = scmp.lt.u32.totalorder %s837_s20, %s1077_s11 }
 0x200   : > { %p839_p10 = pnand %p838_p7, %p998_p6 }
 0x201   : > { %p844_p0 = por %p843_p13, %p842_p12 }
 0x202   : > { %p840_p11 = pneg %p839_p10 }
 0x203   : > { %p846_p2 = por %p845_p1, %p844_p0 }
 0x205   : > { %p847_p3 = pnand %p846_p2, %p840_p11 }
 0x207   : > { %850 = shalt.err (!%p847_p3)
}
 0x208   : > { %s921_s17 = smov 256   ;;  %s922_s29 = smov 16   ;;  %v494_v16 = vpop.permute.xlu0 %493  ;;  %v573_v17 = vpop.f32.mrb[8].mxu1 }
 0x209   : > { %762 = dma.vmem_to_hbm [thread:$0]  (%p998_p6), %s1072_s26, 1024, %s1077_s11, %s596_s15, %s921_s17, %s921_s17, %s922_s29   ;;  %v574_v18 = vadd.f32 %v573_v17, %v494_v16  ;;  %v575_v19 = vpop.f32.mrb[9].mxu1 }
 0x20a   : > { %v576_v20 = vadd.f32 %v575_v19, %v494_v16  ;;  %v577_v21 = vpop.f32.mrb[10].mxu1  ;;  %s1112_s9 = scalar_lea.hbm %s1165_s5, %s757_s12  ;;  %s591_s26 = scalar_lea.sflag [#allocation4], %s1017_s16 }
 0x20b   : > { %588 = vst [vmem:[%s1080_s13] sm:$0xff] %v574_v18  ;;  %v578_v22 = vpop.f32.mrb[11].mxu1  ;;  %s851_s11 = scalar_lea.vmem %s1116_s14, 256  ;;  %s923_s25 = smov [#allocation3]  }
 0x20c   : > { %589 = vst [vmem:[%s1080_s13 + $0x8] sm:$0xff] %v576_v20  ;;  %p852_p4 = scmp.ne.s32.totalorder %s1116_s14, %s851_s11  ;;  %s855_s15 = sshll.u32 %s923_s25, 4  ;;  %s856_s15 = int_to_ptr.vmem [resolvable:$false] %s855_s15 }
 0x20d   : > { %s857_s12 = scalar_lea.vmem %s856_s15, 512  ;;  %p858_p10 = scmp.lt.s32.totalorder %s1116_s14, %s856_s15 }
 0x20e   : > { %p853_p5 = pnand %p852_p4, %p998_p6  ;;  %p859_p11 = scmp.lt.s32.totalorder %s857_s12, %s851_s11 }
 0x210   : > { %p854_p7 = pneg %p853_p5  ;;  %p860_p12 = por %p859_p11, %p858_p10 }
 0x212   : > { %p861_p13 = pnand %p860_p12, %p854_p7 }
 0x214   : > { %864 = shalt.err (!%p861_p13)
}
 0x215   : > { %s865_s16 = scalar_lea.hbm %s1112_s9, 256  ;;  %s869_s18 = scalar_lea.hbm %s1165_s5, 512 }
 0x216   : > { %p866_p0 = scmp.ne.s32.totalorder %s1112_s9, %s865_s16  ;;  %p870_p3 = scmp.lt.u32.totalorder %s1112_s9, %s1165_s5 }
 0x217   : > { %p871_p4 = scmp.lt.u32.totalorder %s869_s18, %s865_s16  ;;  %p873_p7 = scmp.lt.u32.totalorder %s865_s16, %s1112_s9 }
 0x218   : > { %p867_p1 = pnand %p866_p0, %p998_p6 }
 0x219   : > { %p872_p5 = por %p871_p4, %p870_p3 }
 0x21a   : > { %p868_p2 = pneg %p867_p1 }
 0x21b   : > { %p874_p10 = por %p873_p7, %p872_p5 }
 0x21d   : > { %p875_p11 = pnand %p874_p10, %p868_p2 }
 0x21f   : > { %878 = shalt.err (!%p875_p11)
}
 0x220   : > { %761 = dma.vmem_to_hbm [thread:$0]  (%p998_p6), %s1116_s14, 256, %s1112_s9, %s591_s26  }
 0x221 PF: > { %s638_s29 = sand.u32 1, %s905_s21   ;;  %p766_p12 = pnand %p725_p9, %p1002_p8 }
 0x222   : > { %s639_s20 = scalar_lea.sflag [#allocation4], %s638_s29 }
 0x223   : > { %896 = dma.done.wait (!%p766_p12), %s639_s20, 256  }
 0x224   : > { %898 = vsyncadd (!%p766_p12), %s639_s20, 4294967040  ;;  %s648_s28 = scalar_lea.sflag [#allocation6], %s638_s29 }
 0x225   : > { %900 = dma.done.wait (!%p766_p12), %s648_s28, 1024  }
 0x226   : > { %902 = vsyncadd (!%p766_p12), %s648_s28, 4294966272  ;;  %p20_p6 = scmp.ge.s32.totalorder %s984_s27, 4   ;;  %s1169_s21 = smov %s909_s22 }
 0x227   : > { %s1170_s22 = smov %s913_s23  ;;  %s1171_s23 = smov %s996_s30 }
 0x228   : > { %s1172_s24 = smov %s984_s27  ;;  %22 = sbr.rel (!%p20_p6) target bundleno = 5 (0x5), region = 135 }
 0x22f   :  { %653 = vsyncpa [#allocation4], 1 }
 0x230   :  { %655 = vsyncpa [#allocation4 + $0x1], 1 }
 0x231   :  { %656 = vsyncpa [#allocation6], 1 }
 0x232   :  { %658 = vsyncpa [#allocation6 + $0x1], 1 }

</bundles_post_ra>
